<compile_context>
chip_gen: v6e
topology: v6e:2x2x1
jax: 0.10.0
libtpu: 0.0.40
codegen_flags: <defaults>
</compile_context>

<pallas_src>
import jax
import jax.numpy as jnp
from jax.experimental import pallas as pl
from jax.experimental.pallas import tpu as pltpu
from functools import partial


def attention_kernel(x_ref, wqkv_ref, wp_ref, b_ref, o_ref, *, num_heads, seq_len):
    """One grid step processes bb batch elements, flattened to (bb*N, C) rows.

    x_ref   : (bb*N, C)  bf16  activations (pre-cast in wrapper)
    wqkv_ref: (C, 3C)    bf16  fused QKV weight, columns = [q | k | v],
                               head-major inside each block; softmax scale
                               pre-folded into the q columns
    wp_ref  : (C, C)     bf16  output-projection weight, (in, out) layout
    b_ref   : (1, C)     f32   output-projection bias
    o_ref   : (bb*N, C)        output
    """
    H = num_heads
    N = seq_len
    x = x_ref[...]                                   # (bbN, C) bf16, no cast needed
    bbN, C = x.shape
    Hd = C // H
    bb = bbN // N

    # ---- fused QKV projection: one lane-dense MXU matmul (K = C) -----------
    qkv = jnp.dot(x, wqkv_ref[...], preferred_element_type=jnp.float32)   # (bbN, 3C)
    qkv = qkv.astype(jnp.bfloat16)                   # single cast for all heads

    # Fold (head, batch) into one leading group axis G = H*bb so the whole
    # score / softmax / PV phase runs as a single batched pass.
    def split_heads(block):                          # (bbN, C_q) -> (H*bb, N, Hd)
        parts = [block[:, h * Hd:(h + 1) * Hd].reshape(bb, N, Hd) for h in range(H)]
        return jnp.concatenate(parts, axis=0)        # leading-axis concat (cheap)

    q = split_heads(qkv[:, 0 * C:1 * C])             # (G, N, Hd) bf16 (scale folded)
    k = split_heads(qkv[:, 1 * C:2 * C])
    v = split_heads(qkv[:, 2 * C:3 * C])

    # ---- scores + numerically stable softmax, all heads/batches at once ----
    s = jnp.einsum("gnd,gmd->gnm", q, k,
                   preferred_element_type=jnp.float32)                    # (G, N, N)
    s = s - jnp.max(s, axis=-1, keepdims=True)
    p = jnp.exp(s)
    p = p * pl.reciprocal(jnp.sum(p, axis=-1, keepdims=True), approx=True)

    o = jnp.einsum("gnm,gmd->gnd", p.astype(jnp.bfloat16), v,
                   preferred_element_type=jnp.float32)                    # (G, N, Hd)

    # ---- repack heads (lane concat) and fuse head-concat + output proj -----
    o_cat = jnp.concatenate(
        [o[h * bb:(h + 1) * bb].reshape(bbN, Hd) for h in range(H)],
        axis=-1)                                                          # (bbN, C)
    out = jnp.dot(o_cat.astype(jnp.bfloat16), wp_ref[...],
                  preferred_element_type=jnp.float32) + b_ref[...]
    o_ref[...] = out.astype(o_ref.dtype)


def attention_forward(x, w_qkv, w_proj, b_proj, num_heads, *, batch_block=None):
    """x: (B, N, C).  Weights in PyTorch nn.Linear layout:
       w_qkv: (3C, C), w_proj: (C, C), b_proj: (C,).

    batch_block: batch elements per grid step.  Default = B (single grid step,
    best for single-TC v5e/v6e).  On v7x set batch_block = B // 2 so both
    TensorCores get a grid step.
    """
    B, N, C = x.shape
    H = num_heads
    Hd = C // H
    scale = Hd ** (-0.5)
    bb = B if batch_block is None else batch_block
    assert B % bb == 0

    # ---- layout plumbing in the wrapper (free at kernel time) --------------
    w_qkv_t = w_qkv.T.astype(jnp.float32)            # (C, 3C): [q | k | v], head-major inside
    wq = w_qkv_t[:, 0 * C:1 * C] * scale             # fold softmax scale into Q weight
    wk = w_qkv_t[:, 1 * C:2 * C]
    wv = w_qkv_t[:, 2 * C:3 * C]
    wqkv = jnp.concatenate([wq, wk, wv], axis=1).astype(jnp.bfloat16)   # (C, 3C)
    wp = w_proj.T.astype(jnp.bfloat16)               # (C, C) in (in, out) layout
    b2 = b_proj.reshape(1, C).astype(jnp.float32)

    # Pre-cast x to bf16 and flatten batch: halves x DMA bytes, lane-dense slab.
    x2d = x.reshape(B * N, C).astype(jnp.bfloat16)

    kernel = partial(attention_kernel, num_heads=H, seq_len=N)
    rows = bb * N

    out2d = pl.pallas_call(
        kernel,
        out_shape=jax.ShapeDtypeStruct((B * N, C), x.dtype),
        grid_spec=pltpu.PrefetchScalarGridSpec(
            num_scalar_prefetch=0,
            grid=(B // bb,),
            in_specs=[
                pl.BlockSpec((rows, C), lambda i: (i, 0)),      # activations
                pl.BlockSpec((C, 3 * C), lambda i: (0, 0)),     # fused QKV weight
                pl.BlockSpec((C, C), lambda i: (0, 0)),         # proj weight
                pl.BlockSpec((1, C), lambda i: (0, 0)),         # proj bias
            ],
            out_specs=pl.BlockSpec((rows, C), lambda i: (i, 0)),
        ),
        compiler_params=pltpu.CompilerParams(
            dimension_semantics=("parallel",)),
    )(x2d, wqkv, wp, b2)
    return out2d.reshape(B, N, C)


def reference_forward(x, w_qkv, w_proj, b_proj, num_heads):
    """Pure-JAX f32 reference mirroring the PyTorch module exactly."""
    B, N, C = x.shape
    H = num_heads
    Hd = C // H
    scale = Hd ** (-0.5)
    qkv = x @ w_qkv.T                                    # (B, N, 3C)
    qkv = qkv.reshape(B, N, 3, H, Hd).transpose(2, 0, 3, 1, 4)
    q, k, v = qkv[0], qkv[1], qkv[2]                     # (B, H, N, Hd)
    attn = jnp.einsum("bhnd,bhmd->bhnm", q, k) * scale
    attn = jax.nn.softmax(attn, axis=-1)
    out = jnp.einsum("bhnm,bhmd->bhnd", attn, v)         # (B, H, N, Hd)
    out = out.transpose(0, 2, 1, 3).reshape(B, N, C)
    return out @ w_proj.T + b_proj


if __name__ == "__main__":
    # Small shapes consistent with the module: dim divisible by num_heads=3.
    B, N, C = 2, 8, 48
    num_heads = 3

    key = jax.random.PRNGKey(0)
    kx, kw1, kw2, kb = jax.random.split(key, 4)

    x = jax.random.normal(kx, (B, N, C), dtype=jnp.float32)
    # PyTorch nn.Linear layout: weight is (out_features, in_features).
    w_qkv = jax.random.normal(kw1, (3 * C, C), dtype=jnp.float32) * 0.05
    w_proj = jax.random.normal(kw2, (C, C), dtype=jnp.float32) * 0.05
    b_proj = jax.random.normal(kb, (C,), dtype=jnp.float32) * 0.05

    out = attention_forward(x, w_qkv, w_proj, b_proj, num_heads)
    out = jax.block_until_ready(out)

    ref = reference_forward(x, w_qkv, w_proj, b_proj, num_heads)
    assert out.shape == (B, N, C)
    # bf16 matmul operands with f32 accumulation -> compare at bf16 tolerance.
    max_diff = float(jnp.max(jnp.abs(out - ref)))
    assert jnp.allclose(out, ref, atol=2e-2, rtol=2e-2), (
        f"mismatch vs reference, max abs diff = {max_diff}")

    print("KERNEL_OK")
</pallas_src>

<mosaic_0001>
module attributes {stable_mosaic.version = 11 : i64} {
  func.func @attention_kernel(%arg0: i32, %arg1: memref<16x48xbf16, #tpu.memory_space<vmem>>, %arg2: memref<48x144xbf16, #tpu.memory_space<vmem>>, %arg3: memref<48x48xbf16, #tpu.memory_space<vmem>>, %arg4: memref<1x48xf32, #tpu.memory_space<vmem>>, %arg5: memref<16x48xf32, #tpu.memory_space<vmem>>) attributes {dimension_semantics = [#tpu.dimension_semantics<parallel>], iteration_bounds = array<i64: 1>, scalar_prefetch = 0 : i64, scratch_operands = 0 : i64, tpu.core_type = #tpu.core_type<tc>, window_params = [{transform_indices = @transform_0, window_bounds = array<i64: 16, 48>}, {pipeline_mode = #tpu.pipeline_mode<synchronous>, transform_indices = @transform_1, window_bounds = array<i64: 48, 144>}, {pipeline_mode = #tpu.pipeline_mode<synchronous>, transform_indices = @transform_2, window_bounds = array<i64: 48, 48>}, {pipeline_mode = #tpu.pipeline_mode<synchronous>, transform_indices = @transform_3, window_bounds = array<i64: 1, 48>}, {transform_indices = @transform_4, window_bounds = array<i64: 16, 48>}]} {
    %c0 = arith.constant 0 : index
    %c0_0 = arith.constant 0 : index
    %0 = vector.load %arg1[%c0, %c0_0] : memref<16x48xbf16, #tpu.memory_space<vmem>>, vector<16x48xbf16>
    %c0_1 = arith.constant 0 : index
    %c0_2 = arith.constant 0 : index
    %1 = vector.load %arg2[%c0_1, %c0_2] : memref<48x144xbf16, #tpu.memory_space<vmem>>, vector<48x144xbf16>
    %cst = arith.constant dense<0.000000e+00> : vector<16x144xf32>
    %2 = tpu.matmul %0, %1, %cst {dimension_numbers = #tpu.dot_dimension_numbers<[1], [0], [0], [1], [0, 0, 1, 1], [], []>} : vector<16x48xbf16>, vector<48x144xbf16>, vector<16x144xf32> -> vector<16x144xf32>
    %3 = arith.truncf %2 : vector<16x144xf32> to vector<16x144xbf16>
    %4 = vector.extract_strided_slice %3 {offsets = [0, 0], sizes = [16, 48], strides = [1, 1]} : vector<16x144xbf16> to vector<16x48xbf16>
    %5 = vector.extract_strided_slice %4 {offsets = [0, 0], sizes = [16, 16], strides = [1, 1]} : vector<16x48xbf16> to vector<16x16xbf16>
    %6 = vector.shape_cast %5 : vector<16x16xbf16> to vector<2x8x16xbf16>
    %7 = vector.extract_strided_slice %4 {offsets = [0, 16], sizes = [16, 16], strides = [1, 1]} : vector<16x48xbf16> to vector<16x16xbf16>
    %8 = vector.shape_cast %7 : vector<16x16xbf16> to vector<2x8x16xbf16>
    %9 = vector.extract_strided_slice %4 {offsets = [0, 32], sizes = [16, 16], strides = [1, 1]} : vector<16x48xbf16> to vector<16x16xbf16>
    %10 = vector.shape_cast %9 : vector<16x16xbf16> to vector<2x8x16xbf16>
    %11 = tpu.concatenate %6, %8, %10 in 0 : vector<2x8x16xbf16>, vector<2x8x16xbf16>, vector<2x8x16xbf16> -> vector<6x8x16xbf16>
    %12 = vector.extract_strided_slice %3 {offsets = [0, 48], sizes = [16, 48], strides = [1, 1]} : vector<16x144xbf16> to vector<16x48xbf16>
    %13 = vector.extract_strided_slice %12 {offsets = [0, 0], sizes = [16, 16], strides = [1, 1]} : vector<16x48xbf16> to vector<16x16xbf16>
    %14 = vector.shape_cast %13 : vector<16x16xbf16> to vector<2x8x16xbf16>
    %15 = vector.extract_strided_slice %12 {offsets = [0, 16], sizes = [16, 16], strides = [1, 1]} : vector<16x48xbf16> to vector<16x16xbf16>
    %16 = vector.shape_cast %15 : vector<16x16xbf16> to vector<2x8x16xbf16>
    %17 = vector.extract_strided_slice %12 {offsets = [0, 32], sizes = [16, 16], strides = [1, 1]} : vector<16x48xbf16> to vector<16x16xbf16>
    %18 = vector.shape_cast %17 : vector<16x16xbf16> to vector<2x8x16xbf16>
    %19 = tpu.concatenate %14, %16, %18 in 0 : vector<2x8x16xbf16>, vector<2x8x16xbf16>, vector<2x8x16xbf16> -> vector<6x8x16xbf16>
    %20 = vector.extract_strided_slice %3 {offsets = [0, 96], sizes = [16, 48], strides = [1, 1]} : vector<16x144xbf16> to vector<16x48xbf16>
    %21 = vector.extract_strided_slice %20 {offsets = [0, 0], sizes = [16, 16], strides = [1, 1]} : vector<16x48xbf16> to vector<16x16xbf16>
    %22 = vector.shape_cast %21 : vector<16x16xbf16> to vector<2x8x16xbf16>
    %23 = vector.extract_strided_slice %20 {offsets = [0, 16], sizes = [16, 16], strides = [1, 1]} : vector<16x48xbf16> to vector<16x16xbf16>
    %24 = vector.shape_cast %23 : vector<16x16xbf16> to vector<2x8x16xbf16>
    %25 = vector.extract_strided_slice %20 {offsets = [0, 32], sizes = [16, 16], strides = [1, 1]} : vector<16x48xbf16> to vector<16x16xbf16>
    %26 = vector.shape_cast %25 : vector<16x16xbf16> to vector<2x8x16xbf16>
    %27 = tpu.concatenate %22, %24, %26 in 0 : vector<2x8x16xbf16>, vector<2x8x16xbf16>, vector<2x8x16xbf16> -> vector<6x8x16xbf16>
    "tpu.trace_start"() <{level = 10 : i32, message = "gnd,gmd->gnm"}> : () -> ()
    %cst_3 = arith.constant dense<0.000000e+00> : vector<6x8x8xf32>
    %28 = tpu.matmul %11, %19, %cst_3 {dimension_numbers = #tpu.dot_dimension_numbers<[2], [2], [1], [1], [0, 0, 0, 1, 1, 1], [0], [0]>} : vector<6x8x16xbf16>, vector<6x8x16xbf16>, vector<6x8x8xf32> -> vector<6x8x8xf32>
    "tpu.trace_stop"() : () -> ()
    %cst_4 = arith.constant dense<0xFF800000> : vector<6x8xf32>
    %29 = vector.multi_reduction <maximumf>, %28, %cst_4 [2] : vector<6x8x8xf32> to vector<6x8xf32>
    %30 = vector.shape_cast %29 : vector<6x8xf32> to vector<6x8x1xf32>
    %31 = vector.broadcast %30 : vector<6x8x1xf32> to vector<6x8x8xf32>
    %32 = arith.subf %28, %31 : vector<6x8x8xf32>
    %33 = math.exp %32 : vector<6x8x8xf32>
    %cst_5 = arith.constant dense<0.000000e+00> : vector<6x8xf32>
    %34 = vector.multi_reduction <add>, %33, %cst_5 [2] : vector<6x8x8xf32> to vector<6x8xf32>
    %35 = vector.shape_cast %34 : vector<6x8xf32> to vector<6x8x1xf32>
    %36 = tpu.reciprocal %35 {approx = true} : vector<6x8x1xf32> -> vector<6x8x1xf32>
    %37 = vector.broadcast %36 : vector<6x8x1xf32> to vector<6x8x8xf32>
    %38 = arith.mulf %33, %37 : vector<6x8x8xf32>
    %39 = arith.truncf %38 : vector<6x8x8xf32> to vector<6x8x8xbf16>
    "tpu.trace_start"() <{level = 10 : i32, message = "gnm,gmd->gnd"}> : () -> ()
    %cst_6 = arith.constant dense<0.000000e+00> : vector<6x8x16xf32>
    %40 = tpu.matmul %39, %27, %cst_6 {dimension_numbers = #tpu.dot_dimension_numbers<[2], [1], [1], [2], [0, 0, 0, 1, 1, 2], [0], [0]>} : vector<6x8x8xbf16>, vector<6x8x16xbf16>, vector<6x8x16xf32> -> vector<6x8x16xf32>
    "tpu.trace_stop"() : () -> ()
    %41 = vector.extract_strided_slice %40 {offsets = [0, 0, 0], sizes = [2, 8, 16], strides = [1, 1, 1]} : vector<6x8x16xf32> to vector<2x8x16xf32>
    %42 = vector.shape_cast %41 : vector<2x8x16xf32> to vector<16x16xf32>
    %43 = vector.extract_strided_slice %40 {offsets = [2, 0, 0], sizes = [2, 8, 16], strides = [1, 1, 1]} : vector<6x8x16xf32> to vector<2x8x16xf32>
    %44 = vector.shape_cast %43 : vector<2x8x16xf32> to vector<16x16xf32>
    %45 = vector.extract_strided_slice %40 {offsets = [4, 0, 0], sizes = [2, 8, 16], strides = [1, 1, 1]} : vector<6x8x16xf32> to vector<2x8x16xf32>
    %46 = vector.shape_cast %45 : vector<2x8x16xf32> to vector<16x16xf32>
    %47 = tpu.concatenate %42, %44, %46 in 1 : vector<16x16xf32>, vector<16x16xf32>, vector<16x16xf32> -> vector<16x48xf32>
    %48 = arith.truncf %47 : vector<16x48xf32> to vector<16x48xbf16>
    %c0_7 = arith.constant 0 : index
    %c0_8 = arith.constant 0 : index
    %49 = vector.load %arg3[%c0_7, %c0_8] : memref<48x48xbf16, #tpu.memory_space<vmem>>, vector<48x48xbf16>
    %cst_9 = arith.constant dense<0.000000e+00> : vector<16x48xf32>
    %50 = tpu.matmul %48, %49, %cst_9 {dimension_numbers = #tpu.dot_dimension_numbers<[1], [0], [0], [1], [0, 0, 1, 1], [], []>} : vector<16x48xbf16>, vector<48x48xbf16>, vector<16x48xf32> -> vector<16x48xf32>
    %c0_10 = arith.constant 0 : index
    %c0_11 = arith.constant 0 : index
    %51 = vector.load %arg4[%c0_10, %c0_11] : memref<1x48xf32, #tpu.memory_space<vmem>>, vector<1x48xf32>
    %52 = vector.broadcast %51 : vector<1x48xf32> to vector<16x48xf32>
    %53 = arith.addf %50, %52 : vector<16x48xf32>
    %c0_12 = arith.constant 0 : index
    %c0_13 = arith.constant 0 : index
    %54 = vector.load %arg5[%c0_12, %c0_13] : memref<16x48xf32, #tpu.memory_space<vmem>>, vector<16x48xf32>
    tpu.vector_store %arg5[%c0_12, %c0_13], %53 {strides = array<i32>} : memref<16x48xf32, #tpu.memory_space<vmem>>, vector<16x48xf32>,
    return
  }
  func.func @transform_0(%arg0: i32) -> (i32, i32) {
    %c0_i32 = arith.constant 0 : i32
    %c0_i32_0 = arith.constant 0 : i32
    return %arg0, %c0_i32 : i32, i32
  }
  func.func @transform_1(%arg0: i32) -> (i32, i32) {
    %c0_i32 = arith.constant 0 : i32
    %c0_i32_0 = arith.constant 0 : i32
    %c0_i32_1 = arith.constant 0 : i32
    return %c0_i32, %c0_i32_0 : i32, i32
  }
  func.func @transform_2(%arg0: i32) -> (i32, i32) {
    %c0_i32 = arith.constant 0 : i32
    %c0_i32_0 = arith.constant 0 : i32
    %c0_i32_1 = arith.constant 0 : i32
    return %c0_i32, %c0_i32_0 : i32, i32
  }
  func.func @transform_3(%arg0: i32) -> (i32, i32) {
    %c0_i32 = arith.constant 0 : i32
    %c0_i32_0 = arith.constant 0 : i32
    %c0_i32_1 = arith.constant 0 : i32
    return %c0_i32, %c0_i32_0 : i32, i32
  }
  func.func @transform_4(%arg0: i32) -> (i32, i32) {
    %c0_i32 = arith.constant 0 : i32
    %c0_i32_0 = arith.constant 0 : i32
    return %arg0, %c0_i32 : i32, i32
  }
}

</mosaic_0001>

<bundles_post_ra>
// kernel: tpu_custom_call.1
= control target key start
LH: loop header
LB: loop body
LE: loop exit
PB: predicated region body
PF: predicated region fallthrough
CT: control target
= control target key end

     0   :  { %9 = vsyncpa [#allocation3], 0  ;;  %s1434_s0 = inlined_call_operand.hbm [shape: bf16[16,48], index: 0, kind: input, shape index: {}]   ;;  %s1435_s1 = inlined_call_operand.hbm [shape: bf16[48,144], index: 1, kind: input, shape index: {}]   ;;  %s1436_s2 = inlined_call_operand.hbm [shape: bf16[48,48], index: 2, kind: input, shape index: {}]   ;;  %s1437_s3 = inlined_call_operand.vmem [shape: f32[1,48], index: 3, kind: input, shape index: {}]   ;;  %s1438_s4 = inlined_call_operand.hbm [shape: f32[16,48], index: 4, kind: output, shape index: {}]  }
   0x1   :  { %10 = vsyncpa [#allocation6], 0 }
   0x2   :  { %11 = vsyncpa [#allocation4], 0  ;;  %s1252_s15 = smov [#allocation5]  }
   0x3   :  { %s29_s16 = sshll.u32 %s1252_s15, 4  ;;  %s30_s16 = int_to_ptr.vmem [resolvable:$true] %s29_s16 }
   0x4   :  { %s1174_s17 = scalar_lea.vmem %s30_s16, 768  ;;  %p1179_p1 = scmp.lt.s32.totalorder %s30_s16, %s30_s16 }
   0x5   :  { %p1175_p0 = scmp.ne.s32.totalorder %s30_s16, %s1174_s17  ;;  %p1180_p2 = scmp.lt.s32.totalorder %s1174_s17, %s1174_s17 }
   0x7   :  { %p1181_p3 = por %p1180_p2, %p1179_p1 }
   0x9   :  { %p1182_p4 = pnand %p1181_p3, %p1175_p0 }
   0xb   :  { %1185 = shalt.err (!%p1182_p4)
}
   0xc   :  { %s1253_s18 = smov 128   ;;  %s1254_s19 = smov 8  }
   0xd   :  { %35 = dma.hbm_to_vmem [thread:$0]  %s1435_s1, 768, %s30_s16, [#allocation6], %s1253_s18, %s1253_s18, %s1254_s19  }
   0xe   :  { %s1255_s22 = smov [#allocation2]  }
   0xf   :  { %s17_s23 = sshll.u32 %s1255_s22, 4  ;;  %s18_s23 = int_to_ptr.vmem [resolvable:$true] %s17_s23 }
  0x10   :  { %s1194_s24 = scalar_lea.vmem %s18_s23, 128  ;;  %p1199_p6 = scmp.lt.s32.totalorder %s18_s23, %s18_s23 }
  0x11   :  { %p1195_p5 = scmp.ne.s32.totalorder %s18_s23, %s1194_s24  ;;  %p1200_p7 = scmp.lt.s32.totalorder %s1194_s24, %s1194_s24 }
  0x13   :  { %p1201_p8 = por %p1200_p7, %p1199_p6 }
  0x15   :  { %p1202_p9 = pnand %p1201_p8, %p1195_p5 }
  0x17   :  { %1205 = shalt.err (!%p1202_p9)
}
  0x18   :  { %s1256_s25 = smov 64   ;;  %s1257_s26 = smov 4  }
  0x19   :  { %23 = dma.hbm_to_vmem [thread:$0]  %s1434_s0, 128, %s18_s23, [#allocation3], %s1256_s25, %s1256_s25, %s1257_s26  }
  0x1a   :  { %s1258_s29 = smov [#allocation7]  }
  0x1b   :  { %s41_s30 = sshll.u32 %s1258_s29, 4  ;;  %s42_s30 = int_to_ptr.vmem [resolvable:$true] %s41_s30 }
  0x1c   :  { %s1214_s1 = scalar_lea.vmem %s42_s30, 384  ;;  %p1219_p11 = scmp.lt.s32.totalorder %s42_s30, %s42_s30 }
  0x1d   :  { %p1215_p10 = scmp.ne.s32.totalorder %s42_s30, %s1214_s1  ;;  %p1220_p12 = scmp.lt.s32.totalorder %s1214_s1, %s1214_s1 }
  0x1f   :  { %p1221_p13 = por %p1220_p12, %p1219_p11 }
  0x21   :  { %p1222_p0 = pnand %p1221_p13, %p1215_p10 }
  0x23   :  { %1225 = shalt.err (!%p1222_p0)
}
  0x24   :  { %47 = dma.hbm_to_vmem [thread:$0]  %s1436_s2, 384, %s42_s30, [#allocation6], %s1256_s25, %s1256_s25, %s1257_s26  }
  0x25   :  { %1246 = dma.done.wait [#allocation3], 128  }
  0x26   :  { %1247 = vsyncadd [#allocation3], 4294967168 }
  0x27   :  { %1248 = dma.done.wait [#allocation6], 1152  }
  0x28   :  { %1249 = vsyncadd [#allocation6], 4294966144  ;;  %v1259_v0 = vmov 0   ;;  %v1129_v1 = vld [vmem:[#allocation5 + $0x24] ss:$8 sps:$4 sm:$0xff]   ;;  %v1138_v7 = vld [vmem:[#allocation2] sm:$0xff]  }
  0x29   :  { %139 = vmatprep.mubr.bf16.mxu0 %v1259_v0  ;;  %v1131_v2 = vld [vmem:[#allocation5 + $0x20] ss:$8 sps:$4 sm:$0xff]   ;;  %117 = vmatprep.subr.bf16.mxu0 %v1129_v1  ;;  %v1132_v3 = vld [vmem:[#allocation5 + $0x14] ss:$8 sps:$4 sm:$0xff]   ;;  %v1134_v4 = vld [vmem:[#allocation5 + $0x10] ss:$8 sps:$4 sm:$0xff]  }
  0x2a   :  { %118 = vmatpush1.bf16.msra.mxu0 %v1131_v2  ;;  %v1135_v5 = vld [vmem:[#allocation5 + $0x4] ss:$8 sps:$4 sm:$0xff]   ;;  %v1137_v6 = vld [vmem:[#allocation5] ss:$8 sps:$4 sm:$0xff]   ;;  %vm103_vm0 = vcmask 392192   ;;  %v1260_v8 = vmov 0.0  }
  0x2b   :  { %119 = vmatprep.subr.bf16.mxu0 %v1132_v3  ;;  %1021 = vmatprep.subr.bf16.mxu1 %v1260_v8  ;;  %s1261_s0 = smov 96   ;;  %s1262_s2 = smov 112   ;;  %vm1263_vm1 = vmmov 0   ;;  %vm176_vm2 = vcmask 130048   ;;  %vm471_vm3 = vcmask 64512   ;;  %vm549_vm4 = vcmask 1043456  }
  0x2c   :  { %1023 = vmatprep.mubr.msk.bf16.mxu1 %vm1263_vm1, %v1260_v8  ;;  %s1264_s7 = smov 80   ;;  %s1265_s8 = smov 32   ;;  %vm855_vm5 = vcmask 261120  }
  0x2d   :  { %s1266_s9 = smov 16   ;;  %s1267_s12 = smov [#allocation8]  }
  0x2e   :  { %120 = vmatpush1.bf16.msra.mxu0 %v1134_v4  ;;  %s941_s13 = sshll.u32 %s1267_s12, 4  ;;  %s942_s13 = int_to_ptr.vmem [resolvable:$true] %s941_s13 }
  0x2f   :  { %121 = vmatprep.subr.bf16.mxu0 %v1135_v5  ;;  %s1226_s14 = scalar_lea.vmem %s942_s13, 256  ;;  %p1231_p2 = scmp.lt.s32.totalorder %s942_s13, %s942_s13 }
  0x30   :  { %p1227_p1 = scmp.ne.s32.totalorder %s942_s13, %s1226_s14  ;;  %p1232_p3 = scmp.lt.s32.totalorder %s1226_s14, %s1226_s14 }
  0x32   :  { %122 = vmatpush1.bf16.msra.mxu0 %v1137_v6  ;;  %p1233_p4 = por %p1232_p3, %p1231_p2 }
  0x33   :  { %1033 = vmatprep.subr.bf16.mxu0 %v1260_v8 }
  0x34   :  { %p1234_p5 = pnand %p1233_p4, %p1227_p1 }
  0x35   :  { %961 = vmatmul.mubr.msk.bf16.vlgmr.msra.gmra.mxu0 %vm103_vm0, %v1138_v7 }
  0x36   :  { %1035 = vmatprep.mubr.msk.bf16.mxu0 %vm1263_vm1, %v1260_v8 }
  0xf5   :  { %v141_v9 = vpop.f32.mrf.mxu0 }
  0xf6   :  { %v1308_v10 = vpack.c.bf16 %v141_v9, %v141_v9 }
  0xf7   :  { %v143_v11 = vpop.f32.mrf.mxu0 }
  0xf8   :  { %161 = vrot.lane.b32.xlu1 %v1308_v10, %s1261_s0  ;;  %157 = vrot.lane.b32.xlu0 %v1308_v10, %s1262_s2  ;;  %v991_v24 = vpack.c.bf16 %v143_v11, %v143_v11 }
  0xf9   :  { %v145_v12 = vpop.f32.mrf.mxu0 }
  0xfa   :  { %v1313_v13 = vpack.c.bf16 %v145_v12, %v145_v12 }
  0xfb   :  { %v147_v45 = vpop.f32.mrf.mxu0 }
  0xfc   :  { %163 = vrot.lane.b32.xlu1 %v1313_v13, %s1261_s0  ;;  %159 = vrot.lane.b32.xlu0 %v1313_v13, %s1262_s2  ;;  %v992_v2 = vpack.c.bf16 %v147_v45, %v147_v45 }
 0x100   :  { %223 = vrot.lane.b32.xlu1 %v1313_v13, %s1264_s7  ;;  %174 = vrot.lane.b32.xlu0 %v1308_v10, %s1264_s7 }
 0x16a   :  { %v162_v14 = vpop.permute.xlu1 %161  ;;  %v158_v15 = vpop.permute.xlu0 %157 }
 0x16b   :  { %v1324_v16 = vcombine.low %v158_v15, %v158_v15  ;;  %v972_v18 = vcombine.low %v162_v14, %v162_v14 }
 0x16d   :  { %273 = vrot.lane.b32.xlu0 %v1324_v16, %s1264_s7 }
 0x16e   :  { %v160_v17 = vpop.permute.xlu0 %159  ;;  %v164_v20 = vpop.permute.xlu1 %163 }
 0x16f   :  { %v1327_v19 = vcombine.low %v160_v17, %v160_v17  ;;  %v974_v22 = vcombine.low %v164_v20, %v164_v20 }
 0x171   :  { %373 = vrot.lane.b32.xlu0 %v972_v18, %s1264_s7  ;;  %323 = vrot.lane.b32.xlu1 %v1327_v19, %s1264_s7 }
 0x172   :  { %v175_v21 = vpop.permute.xlu0 %174  ;;  %v224_v25 = vpop.permute.xlu1 %223 }
 0x173   :  { %v181_v23 = vsel %vm176_vm2, %v175_v21, 0  ;;  %v229_v26 = vsel %vm176_vm2, %v224_v25, 0 }
 0x174   :  { %1022 = vmatpush3.bf16.xpose.msra.mxu1 %v181_v23 }
 0x175   :  { %423 = vrot.lane.b32.xlu1 %v974_v22, %s1264_s7  ;;  %1027 = vmatprep.subr.bf16.mxu1 %v1260_v8 }
 0x179   :  { %170 = vrot.lane.b32.xlu1 %v991_v24, %s1261_s0 }
 0x17b   :  { %1024 = vmatmul.mubr.msk.bf16.vlgmr.msra.gmra.mxu1 %vm176_vm2, %v1308_v10 }
 0x17c   :  { %1028 = vmatpush3.bf16.xpose.msra.mxu1 %v229_v26  ;;  %1029 = vmatprep.mubr.msk.bf16.mxu1 %vm1263_vm1, %v1260_v8 }
 0x17d   :  { %1039 = vmatprep.subr.bf16.mxu1 %v1260_v8 }
 0x183   :  { %1030 = vmatmul.mubr.msk.bf16.vlgmr.msra.gmra.mxu1 %vm176_vm2, %v1313_v13 }
 0x184   :  { %1041 = vmatprep.mubr.msk.bf16.mxu1 %vm1263_vm1, %v1260_v8 }
 0x1df   :  { %v274_v27 = vpop.permute.xlu0 %273 }
 0x1e0   :  { %v279_v28 = vsel %vm176_vm2, %v274_v27, 0 }
 0x1e1   :  { %1034 = vmatpush3.bf16.xpose.msra.mxu0 %v279_v28 }
 0x1e2   :  { %1045 = vmatprep.subr.bf16.mxu0 %v1260_v8 }
 0x1e3   :  { %v324_v29 = vpop.permute.xlu1 %323  ;;  %v374_v31 = vpop.permute.xlu0 %373 }
 0x1e4   :  { %v329_v30 = vsel %vm176_vm2, %v324_v29, 0  ;;  %v379_v32 = vsel %vm176_vm2, %v374_v31, 0 }
 0x1e5   :  { %1040 = vmatpush3.bf16.xpose.msra.mxu1 %v329_v30 }
 0x1e6   :  { %1051 = vmatprep.subr.bf16.mxu1 %v1260_v8 }
 0x1e7   :  { %v424_v33 = vpop.permute.xlu1 %423 }
 0x1e8   :  { %1036 = vmatmul.mubr.msk.bf16.vlgmr.msra.gmra.mxu0 %vm176_vm2, %v158_v15  ;;  %v429_v34 = vsel %vm176_vm2, %v424_v33, 0 }
 0x1e9   :  { %1046 = vmatpush3.bf16.xpose.msra.mxu0 %v379_v32  ;;  %1047 = vmatprep.mubr.msk.bf16.mxu0 %vm1263_vm1, %v1260_v8 }
 0x1ea   :  { %1057 = vmatprep.subr.bf16.mxu0 %v1260_v8 }
 0x1eb   :  { %v171_v3 = vpop.permute.xlu1 %170 }
 0x1ec   :  { %1042 = vmatmul.mubr.msk.bf16.vlgmr.msra.gmra.mxu1 %vm176_vm2, %v160_v17 }
 0x1ed   :  { %1052 = vmatpush3.bf16.xpose.msra.mxu1 %v429_v34  ;;  %1053 = vmatprep.mubr.msk.bf16.mxu1 %vm1263_vm1, %v1260_v8 }
 0x1ee   :  { %1063 = vmatprep.subr.bf16.mxu1 %v1260_v8 }
 0x1f0   :  { %1048 = vmatmul.mubr.msk.bf16.vlgmr.msra.gmra.mxu0 %vm176_vm2, %v162_v14 }
 0x1f1   :  { %1059 = vmatprep.mubr.msk.bf16.mxu0 %vm1263_vm1, %v1260_v8 }
 0x1f4   :  { %1054 = vmatmul.mubr.msk.bf16.vlgmr.msra.gmra.mxu1 %vm176_vm2, %v164_v20 }
 0x1f5   :  { %1065 = vmatprep.mubr.msk.bf16.mxu1 %vm1263_vm1, %v1260_v8 }
 0x23b   :  { %v217_v35 = vpop.f32.mrf.mxu1 }
 0x23c   :  { %v472_v36 = vsel %vm471_vm3, %v217_v35, -inf }
 0x23d   :  { %473 = vmax.xlane.f32.xlu0 %v472_v36  ;;  %v1025_v37 = vpop.f32.mrf.mxu1 }
 0x23f   :  { %v220_v38 = vpop.f32.mrf.mxu1 }
 0x241   :  { %v1026_v39 = vpop.f32.mrf.mxu1 }
 0x242   :  { %v980_v39 = vcombine.low %v171_v3, %v171_v3 }
 0x243   :  { %v265_v40 = vpop.f32.mrf.mxu1 }
 0x244   :  { %v475_v41 = vsel %vm471_vm3, %v265_v40, -inf }
 0x245   :  { %476 = vmax.xlane.f32.xlu1 %v475_v41  ;;  %v1031_v42 = vpop.f32.mrf.mxu1 }
 0x247   :  { %v268_v43 = vpop.f32.mrf.mxu1 }
 0x249   :  { %v1032_v44 = vpop.f32.mrf.mxu1 }
 0x2a8   :  { %v315_v46 = vpop.f32.mrf.mxu0 }
 0x2a9   :  { %v478_v47 = vsel %vm471_vm3, %v315_v46, -inf }
 0x2aa   :  { %479 = vmax.xlane.f32.xlu0 %v478_v47  ;;  %v1037_v48 = vpop.f32.mrf.mxu0 }
 0x2ac   :  { %v318_v49 = vpop.f32.mrf.mxu0  ;;  %v365_v50 = vpop.f32.mrf.mxu1 }
 0x2ad   :  { %v481_v51 = vsel %vm471_vm3, %v365_v50, -inf }
 0x2ae   :  { %v1043_v52 = vpop.f32.mrf.mxu1  ;;  %482 = vmax.xlane.f32.xlu0 %v481_v51  ;;  %v1038_v53 = vpop.f32.mrf.mxu0 }
 0x2b0   :  { %v368_v54 = vpop.f32.mrf.mxu1  ;;  %v415_v55 = vpop.f32.mrf.mxu0 }
 0x2b1   :  { %v484_v56 = vsel %vm471_vm3, %v415_v55, -inf }
 0x2b2   :  { %v1044_v57 = vpop.f32.mrf.mxu1  ;;  %485 = vmax.xlane.f32.xlu1 %v484_v56  ;;  %v1049_v58 = vpop.f32.mrf.mxu0 }
 0x2b4   :  { %v418_v59 = vpop.f32.mrf.mxu0  ;;  %v465_v60 = vpop.f32.mrf.mxu1 }
 0x2b5   :  { %v487_v61 = vsel %vm471_vm3, %v465_v60, -inf }
 0x2b6   :  { %v1055_v62 = vpop.f32.mrf.mxu1  ;;  %488 = vmax.xlane.f32.xlu0 %v487_v61  ;;  %v1050_v63 = vpop.f32.mrf.mxu0 }
 0x2b8   :  { %v468_v0 = vpop.f32.mrf.mxu1 }
 0x2ba   :  { %v1056_v1 = vpop.f32.mrf.mxu1 }
 0x2c3   :  { %544 = vrot.lane.b32.xlu1 %v1308_v10, %s1265_s8 }
 0x2c6   :  { %v474_v4 = vpop.xlane.xlu0 %473 }
 0x2c7   :  { %v490_v5 = vsub.f32 %v217_v35, %v474_v4 }
 0x2c9   :  { %v496_v7 = vmul.f32 1.442695, %v490_v5 }
 0x2cb   :  { %1142 = vpow2.f32 %v496_v7 }
 0x2cc   :  { %172 = vrot.lane.b32.xlu0 %v992_v2, %s1261_s0 }
 0x2ce   :  { %v477_v6 = vpop.xlane.xlu1 %476 }
 0x2cf   :  { %v491_v9 = vsub.f32 %v265_v40, %v477_v6 }
 0x2d1   :  { %v498_v11 = vmul.f32 1.442695, %v491_v9 }
 0x2d3   :  { %1144 = vpow2.f32 %v498_v11 }
 0x2d8   :  { %v1143_v12 = vpop.eup %1142 }
 0x2d9   :  { %v508_v14 = vsel %vm471_vm3, %v1143_v12, 0.0 }
 0x2e0   :  { %v1145_v15 = vpop.eup %1144 }
 0x2e1   :  { %v511_v17 = vsel %vm471_vm3, %v1145_v15, 0.0 }
 0x2e7   :  { %509 = vadd.xlane.f32.xlu1 %v508_v14 }
 0x2eb   :  { %512 = vadd.xlane.f32.xlu0 %v511_v17 }
 0x2f8   :  { %641 = vrot.lane.b32.xlu1 %v1324_v16, %s1265_s8 }
 0x2fc   :  { %689 = vrot.lane.b32.xlu1 %v1327_v19, %s1265_s8 }
 0x301   :  { %593 = vrot.lane.b32.xlu0 %v1313_v13, %s1265_s8 }
 0x333   :  { %v480_v10 = vpop.xlane.xlu0 %479 }
 0x334   :  { %v492_v18 = vsub.f32 %v315_v46, %v480_v10 }
 0x336   :  { %v500_v20 = vmul.f32 1.442695, %v492_v18 }
 0x337   :  { %v483_v21 = vpop.xlane.xlu0 %482 }
 0x338   :  { %1146 = vpow2.f32 %v500_v20  ;;  %v493_v22 = vsub.f32 %v365_v50, %v483_v21 }
 0x33a   :  { %v502_v23 = vmul.f32 1.442695, %v493_v22  ;;  %v1139_v22 = vld [vmem:[#allocation7 + $0x10] sm:$0xff]  }
 0x33b   :  { %v486_v24 = vpop.xlane.xlu1 %485 }
 0x33c   :  { %1148 = vpow2.f32 %v502_v23  ;;  %v494_v25 = vsub.f32 %v415_v55, %v486_v24  ;;  %v1140_v23 = vld [vmem:[#allocation7 + $0x8] sm:$0xff]  }
 0x33e   :  { %v504_v26 = vmul.f32 1.442695, %v494_v25 }
 0x33f   :  { %v489_v27 = vpop.xlane.xlu0 %488  ;;  %v545_v16 = vpop.permute.xlu1 %544 }
 0x340   :  { %1150 = vpow2.f32 %v504_v26  ;;  %v495_v28 = vsub.f32 %v465_v60, %v489_v27  ;;  %v551_v19 = vsel %vm549_vm4, %v545_v16, 0  ;;  %v1141_v26 = vld [vmem:[#allocation7] sm:$0xff]  }
 0x341   :  { %1058 = vmatpush3.bf16.msra.mxu0 %v551_v19 }
 0x342   :  { %v506_v13 = vmul.f32 1.442695, %v495_v28  ;;  %1069 = vmatprep.subr.bf16.mxu0 %v1260_v8 }
 0x343   :  { %v173_v37 = vpop.permute.xlu0 %172 }
 0x344   :  { %1152 = vpow2.f32 %v506_v13  ;;  %v982_v38 = vcombine.low %v173_v37, %v173_v37 }
 0x345   :  { %v1147_v29 = vpop.eup %1146 }
 0x346   :  { %v514_v30 = vsel %vm471_vm3, %v1147_v29, 0.0 }
 0x347   :  { %515 = vadd.xlane.f32.xlu1 %v514_v30 }
 0x349   :  { %v1149_v31 = vpop.eup %1148 }
 0x34a   :  { %v517_v32 = vsel %vm471_vm3, %v1149_v31, 0.0 }
 0x34b   :  { %518 = vadd.xlane.f32.xlu0 %v517_v32 }
 0x34d   :  { %v1151_v33 = vpop.eup %1150 }
 0x34e   :  { %v520_v34 = vsel %vm471_vm3, %v1151_v33, 0.0 }
 0x34f   :  { %521 = vadd.xlane.f32.xlu1 %v520_v34 }
 0x351   :  { %v1385_v35 = vpop.eup %1152 }
 0x352   :  { %v523_v36 = vsel %vm471_vm3, %v1385_v35, 0.0 }
 0x353   :  { %524 = vadd.xlane.f32.xlu0 %v523_v36 }
 0x360   :  { %789 = vrot.lane.b32.xlu1 %v982_v38, %s1265_s8 }
 0x369   :  { %739 = vrot.lane.b32.xlu0 %v980_v39, %s1265_s8 }
 0x370   :  { %v510_v40 = vpop.xlane.xlu1 %509 }
 0x371   :  { %1154 = vrcp.f32 %v510_v40 }
 0x374   :  { %v513_v41 = vpop.xlane.xlu0 %512  ;;  %v642_v45 = vpop.permute.xlu1 %641 }
 0x375   :  { %1156 = vrcp.f32 %v513_v41  ;;  %v647_v49 = vsel %vm549_vm4, %v642_v45, 0 }
 0x378   :  { %v594_v42 = vpop.permute.xlu0 %593  ;;  %v690_v51 = vpop.permute.xlu1 %689 }
 0x379   :  { %v599_v43 = vsel %vm549_vm4, %v594_v42, 0  ;;  %v695_v53 = vsel %vm549_vm4, %v690_v51, 0 }
 0x37a   :  { %1064 = vmatpush3.bf16.msra.mxu1 %v599_v43 }
 0x37b   :  { %1075 = vmatprep.subr.bf16.mxu1 %v1260_v8 }
 0x37e   :  { %v1155_v44 = vpop.eup %1154 }
 0x37f   :  { %v532_v46 = vmul.f32 %v1155_v44, %v1143_v12 }
 0x381   :  { %v538_v47 = vpack.c.bf16 %v532_v46, %v532_v46 }
 0x382   :  { %v1157_v48 = vpop.eup %1156 }
 0x383   :  { %1060 = vmatmul.mubr.msk.bf16.vlgmr.msra.gmra.mxu0 %vm471_vm3, %v538_v47  ;;  %v533_v50 = vmul.f32 %v1157_v48, %v1145_v15 }
 0x384   :  { %1070 = vmatpush3.bf16.msra.mxu0 %v647_v49  ;;  %1071 = vmatprep.mubr.msk.bf16.mxu0 %vm1263_vm1, %v1260_v8 }
 0x385   :  { %v539_v52 = vpack.c.bf16 %v533_v50, %v533_v50  ;;  %1081 = vmatprep.subr.bf16.mxu0 %v1260_v8  ;;  %v984_v50 = vld [vmem:[%s1437_s3] ss:$0 sm:$0xff] }
 0x387   :  { %1066 = vmatmul.mubr.msk.bf16.vlgmr.msra.gmra.mxu1 %vm471_vm3, %v539_v52 }
 0x388   :  { %1076 = vmatpush3.bf16.msra.mxu1 %v695_v53  ;;  %1077 = vmatprep.mubr.msk.bf16.mxu1 %vm1263_vm1, %v1260_v8 }
 0x389   :  { %1087 = vmatprep.subr.bf16.mxu1 %v1260_v8 }
 0x3d0   :  { %v516_v54 = vpop.xlane.xlu1 %515 }
 0x3d1   :  { %1158 = vrcp.f32 %v516_v54 }
 0x3d4   :  { %v519_v55 = vpop.xlane.xlu0 %518 }
 0x3d5   :  { %1160 = vrcp.f32 %v519_v55 }
 0x3d8   :  { %v522_v56 = vpop.xlane.xlu1 %521 }
 0x3d9   :  { %1162 = vrcp.f32 %v522_v56 }
 0x3dc   :  { %v525_v57 = vpop.xlane.xlu0 %524  ;;  %v790_v1 = vpop.permute.xlu1 %789 }
 0x3dd   :  { %1164 = vrcp.f32 %v525_v57  ;;  %v795_v4 = vsel %vm549_vm4, %v790_v1, 0 }
 0x3de   :  { %v1159_v58 = vpop.eup %1158 }
 0x3df   :  { %v534_v59 = vmul.f32 %v1159_v58, %v1147_v29 }
 0x3e0   :  { %v740_v60 = vpop.permute.xlu0 %739 }
 0x3e1   :  { %v745_v61 = vsel %vm549_vm4, %v740_v60, 0  ;;  %v540_v62 = vpack.c.bf16 %v534_v59, %v534_v59 }
 0x3e2   :  { %v1161_v63 = vpop.eup %1160 }
 0x3e3   :  { %1072 = vmatmul.mubr.msk.bf16.vlgmr.msra.gmra.mxu0 %vm471_vm3, %v540_v62  ;;  %v535_v0 = vmul.f32 %v1161_v63, %v1149_v31 }
 0x3e4   :  { %1082 = vmatpush3.bf16.msra.mxu0 %v745_v61  ;;  %1083 = vmatprep.mubr.msk.bf16.mxu0 %vm1263_vm1, %v1260_v8 }
 0x3e5   :  { %v541_v2 = vpack.c.bf16 %v535_v0, %v535_v0  ;;  %1093 = vmatprep.subr.bf16.mxu0 %v1260_v8 }
 0x3e6   :  { %v1163_v3 = vpop.eup %1162 }
 0x3e7   :  { %1078 = vmatmul.mubr.msk.bf16.vlgmr.msra.gmra.mxu1 %vm471_vm3, %v541_v2  ;;  %v536_v5 = vmul.f32 %v1163_v3, %v1151_v33 }
 0x3e8   :  { %1088 = vmatpush3.bf16.msra.mxu1 %v795_v4  ;;  %1089 = vmatprep.mubr.msk.bf16.mxu1 %vm1263_vm1, %v1260_v8 }
 0x3e9   :  { %v542_v6 = vpack.c.bf16 %v536_v5, %v536_v5 }
 0x3ea   :  { %v1165_v7 = vpop.eup %1164 }
 0x3eb   :  { %1084 = vmatmul.mubr.msk.bf16.vlgmr.msra.gmra.mxu0 %vm471_vm3, %v542_v6  ;;  %v537_v9 = vmul.f32 %v1165_v7, %v1385_v35 }
 0x3ec   :  { %1099 = vmatprep.mubr.msk.bf16.mxu0 %vm1263_vm1, %v1260_v8  ;;  %1094 = vmatpush3.bf16.msra.mxu0 %v1139_v22 }
 0x3ed   :  { %v543_v11 = vpack.c.bf16 %v537_v9, %v537_v9  ;;  %1095 = vmatprep.subr.bf16.mxu0 %v1260_v8 }
 0x3ef   :  { %1090 = vmatmul.mubr.msk.bf16.vlgmr.msra.gmra.mxu1 %vm471_vm3, %v543_v11 }
 0x3f0   :  { %1096 = vmatpush3.bf16.msra.mxu0 %v1140_v23 }
 0x3f1   :  { %1097 = vmatprep.subr.bf16.mxu0 %v1260_v8 }
 0x3f4   :  { %1098 = vmatpush3.bf16.msra.mxu0 %v1141_v26 }
 0x443   :  { %v587_v12 = vpop.f32.mrf.mxu0 }
 0x445   :  { %v1061_v14 = vpop.f32.mrf.mxu0 }
 0x447   :  { %v590_v15 = vpop.f32.mrf.mxu0  ;;  %v635_v17 = vpop.f32.mrf.mxu1 }
 0x449   :  { %v1062_v10 = vpop.f32.mrf.mxu0  ;;  %v1067_v18 = vpop.f32.mrf.mxu1 }
 0x44b   :  { %v638_v20 = vpop.f32.mrf.mxu1 }
 0x44d   :  { %v1068_v21 = vpop.f32.mrf.mxu1 }
 0x4a3   :  { %v683_v24 = vpop.f32.mrf.mxu0 }
 0x4a5   :  { %v1073_v25 = vpop.f32.mrf.mxu0 }
 0x4a7   :  { %v686_v27 = vpop.f32.mrf.mxu0  ;;  %v731_v16 = vpop.f32.mrf.mxu1 }
 0x4a8   :  { %v1119_v28 = vpack.i.bf16 %v731_v16, %v683_v24 }
 0x4a9   :  { %v1074_v19 = vpop.f32.mrf.mxu0  ;;  %v1079_v13 = vpop.f32.mrf.mxu1 }
 0x4aa   :  { %1120 = vrot.lane.b32.xlu0 %v1119_v28, %s1266_s9 }
 0x4ab   :  { %v734_v29 = vpop.f32.mrf.mxu1  ;;  %v781_v30 = vpop.f32.mrf.mxu0 }
 0x4ad   :  { %v1080_v31 = vpop.f32.mrf.mxu1  ;;  %v1085_v32 = vpop.f32.mrf.mxu0 }
 0x4af   :  { %v784_v33 = vpop.f32.mrf.mxu0  ;;  %v831_v34 = vpop.f32.mrf.mxu1 }
 0x4b0   :  { %v1124_v35 = vpack.i.bf16 %v831_v34, %v781_v30 }
 0x4b1   :  { %v1086_v36 = vpop.f32.mrf.mxu0  ;;  %v1091_v37 = vpop.f32.mrf.mxu1 }
 0x4b2   :  { %1125 = vrot.lane.b32.xlu1 %v1124_v35, %s1265_s8 }
 0x4b3   :  { %v834_v8 = vpop.f32.mrf.mxu1 }
 0x4b5   :  { %v1092_v38 = vpop.f32.mrf.mxu1 }
 0x51c   :  { %v1121_v39 = vpop.permute.xlu0 %1120 }
 0x51d   :  { %v1123_v40 = vunpack.i.h.bf16 %v1121_v39  ;;  %v1122_v41 = vunpack.i.l.bf16 %v1121_v39 }
 0x51f   :  { %v854_v45 = vsel %vm176_vm2, %v635_v17, %v1123_v40  ;;  %v853_v46 = vsel %vm176_vm2, %v587_v12, %v1122_v41 }
 0x524   :  { %v1126_v42 = vpop.permute.xlu1 %1125 }
 0x525   :  { %v1128_v43 = vunpack.i.h.bf16 %v1126_v42  ;;  %v1127_v44 = vunpack.i.l.bf16 %v1126_v42 }
 0x527   :  { %v856_v47 = vsel %vm855_vm5, %v853_v46, %v1127_v44  ;;  %v857_v48 = vsel %vm855_vm5, %v854_v45, %v1128_v43 }
 0x528   :  { %v858_v49 = vpack.c.bf16 %v857_v48, %v856_v47 }
 0x52a   :  { %1100 = vmatmul.mubr.msk.bf16.vlgmr.msra.gmra.mxu0 %vm103_vm0, %v858_v49 }
 0x5ea   :  { %v927_v51 = vpop.f32.mrf.mxu0 }
 0x5eb   :  { %v928_v52 = vadd.f32 %v984_v50, %v927_v51 }
 0x5ec   :  { %v1101_v53 = vpop.f32.mrf.mxu0 }
 0x5ed   :  { %934 = vst.msk [vmem:[#allocation8] sm:$0xff] %vm103_vm0, %v928_v52 }
 0x5ee   :  { %v930_v54 = vpop.f32.mrf.mxu0 }
 0x5ef   :  { %v931_v55 = vadd.f32 %v984_v50, %v930_v54 }
 0x5f0   :  { %v1102_v56 = vpop.f32.mrf.mxu0 }
 0x5f1   :  { %935 = vst.msk [vmem:[#allocation8 + $0x8] sm:$0xff] %vm103_vm0, %v931_v55 }
 0x5f2   :  { %1237 = shalt.err (!%p1234_p5)
}
 0x5f3   :  { %947 = dma.vmem_to_hbm [thread:$0]  %s942_s13, 256, %s1438_s4, [#allocation4], %s1253_s18, %s1253_s18, %s1254_s19  }
 0x5f4   :  { %1250 = dma.done.wait [#allocation4], 256  }
 0x5f5   :  { %1251 = vsyncadd [#allocation4], 4294967040 }
 0x5f6   :  { %951 = vsyncpa [#allocation3], 1 }
 0x5f7   :  { %952 = vsyncpa [#allocation6], 1 }
 0x5f8   :  { %953 = vsyncpa [#allocation4], 1 }

</bundles_post_ra>
